<compile_context>
chip_gen: v7x
topology: tpu7x:2x2x1
jax: 0.10.0
libtpu: 0.0.40
codegen_flags: <defaults>
</compile_context>

<pallas_src>
import math
import jax
import jax.numpy as jnp
from jax.experimental import pallas as pl
from jax.experimental.pallas import tpu as pltpu


def _gelu_exact(x):
    # Matches torch.nn.functional.gelu default (erf-based, exact).
    return 0.5 * x * (1.0 + jax.lax.erf(x / jnp.sqrt(2.0).astype(x.dtype)))


def _round_up(a, b):
    return ((a + b - 1) // b) * b


def feedforward_kernel(x_ref, w1v_ref, w1g_ref, b1v_ref, b1g_ref, w2_ref, b2_ref,
                       o_ref, acc_ref):
    # x_ref  : (tm, D)   compute dtype (bf16)
    # w1v_ref: (D, th)   w1g_ref: (D, th)   (value / gate column slices of W1)
    # b1v_ref: (1, th)   b1g_ref: (1, th)   f32
    # w2_ref : (th, D)   b2_ref : (1, D)    f32 bias
    # acc_ref: (tm, D)   f32 accumulator over the H (reduction) grid axis
    j = pl.program_id(1)

    @pl.when(j == 0)
    def _():
        acc_ref[...] = jnp.zeros_like(acc_ref)

    x = x_ref[...]
    # First linear, split into value / gate halves; f32 accumulation on the MXU.
    val = jnp.dot(x, w1v_ref[...], preferred_element_type=jnp.float32) + b1v_ref[...]
    gate = jnp.dot(x, w1g_ref[...], preferred_element_type=jnp.float32) + b1g_ref[...]
    # GEGLU elementwise math in f32 (v5e has no bf16 VPU/EUP).
    y = val * _gelu_exact(gate)
    # Second linear: accumulate partial products over the H tiles.
    acc_ref[...] += jnp.dot(y.astype(w2_ref.dtype), w2_ref[...],
                            preferred_element_type=jnp.float32)

    @pl.when(j == pl.num_programs(1) - 1)
    def _():
        o_ref[...] = (acc_ref[...] + b2_ref[...]).astype(o_ref.dtype)
    # TODO(synk): Dropout has p=0.0 in the reference module -> identity; not implemented.


def _estimate_vmem_bytes(tm, D, th, out_dtype, compute_dtype):
    cb = jnp.dtype(compute_dtype).itemsize
    ob = jnp.dtype(out_dtype).itemsize
    per_step = (tm * D * cb            # x tile
                + 2 * D * th * cb      # W1 value + gate slices
                + 2 * th * 4           # b1 slices (f32)
                + th * D * cb          # W2 slice
                + D * 4                # b2
                + tm * D * ob)         # output tile
    return 2 * per_step + tm * D * 4   # double-buffered inputs/outputs + f32 accumulator


def feedforward(x, w1, b1, w2, b2, *, tm=256, th=512, compute_dtype=jnp.bfloat16):
    """x: [B, S, D]; w1: [D, 2H]; b1: [2H]; w2: [H, D]; b2: [D] -> [B, S, D]"""
    B, S, D = x.shape
    M = B * S
    H = w2.shape[0]
    assert w1.shape == (D, 2 * H) and b1.shape == (2 * H,)
    assert w2.shape == (H, D) and b2.shape == (D,)

    # Row tile: as large as possible up to tm, multiple of 8 (sublane); pad M if needed.
    tm = min(tm, _round_up(M, 8))
    M_pad = _round_up(M, tm)

    # Hidden tile: multiple of 128 (lane) that divides H, else fall back to full H.
    th = th if (H % th == 0) else H

    x2d = x.reshape(M, D)
    if M_pad != M:
        x2d = jnp.pad(x2d, ((0, M_pad - M), (0, 0)))
    x2d = x2d.astype(compute_dtype)

    # Split W1/b1 into value / gate halves (matches torch.chunk(2, dim=-1) ordering:
    # first half -> value, second half -> gate).
    w1v = w1[:, :H].astype(compute_dtype)
    w1g = w1[:, H:].astype(compute_dtype)
    w2c = w2.astype(compute_dtype)
    b1v = b1[:H].reshape(1, H).astype(jnp.float32)
    b1g = b1[H:].reshape(1, H).astype(jnp.float32)
    b2_2d = b2.reshape(1, D).astype(jnp.float32)

    vmem_limit = int(min(max(_estimate_vmem_bytes(tm, D, th, x.dtype, compute_dtype)
                             + (8 << 20), 32 << 20), 64 << 20))

    out2d = pl.pallas_call(
        feedforward_kernel,
        out_shape=jax.ShapeDtypeStruct((M_pad, D), x.dtype),
        grid_spec=pltpu.PrefetchScalarGridSpec(
            num_scalar_prefetch=0,
            grid=(M_pad // tm, H // th),           # M axis parallel, H axis = reduction (last)
            in_specs=[
                pl.BlockSpec((tm, D), lambda i, j: (i, 0)),      # x tile
                pl.BlockSpec((D, th), lambda i, j: (0, j)),      # W1 value slice
                pl.BlockSpec((D, th), lambda i, j: (0, j)),      # W1 gate slice
                pl.BlockSpec((1, th), lambda i, j: (0, j)),      # b1 value slice
                pl.BlockSpec((1, th), lambda i, j: (0, j)),      # b1 gate slice
                pl.BlockSpec((th, D), lambda i, j: (j, 0)),      # W2 slice
                pl.BlockSpec((1, D), lambda i, j: (0, 0)),       # b2 (finalize only)
            ],
            out_specs=pl.BlockSpec((tm, D), lambda i, j: (i, 0)),
            scratch_shapes=[pltpu.VMEM((tm, D), jnp.float32)],   # f32 accumulator
        ),
        compiler_params=pltpu.CompilerParams(
            dimension_semantics=("parallel", "arbitrary"),
            vmem_limit_bytes=vmem_limit,
        ),
    )(x2d, w1v, w1g, b1v, b1g, w2c, b2_2d)

    return out2d[:M].reshape(B, S, D)


def init_params(key, dim, mult=4, dtype=jnp.float32):
    """Deterministic init mirroring nn.Linear default (uniform(-1/sqrt(fan_in), 1/sqrt(fan_in)))."""
    hidden = dim * mult
    k1, k2, k3, k4 = jax.random.split(key, 4)
    bound1 = 1.0 / math.sqrt(dim)
    bound2 = 1.0 / math.sqrt(hidden)
    w1 = jax.random.uniform(k1, (dim, 2 * hidden), dtype, -bound1, bound1)
    b1 = jax.random.uniform(k2, (2 * hidden,), dtype, -bound1, bound1)
    w2 = jax.random.uniform(k3, (hidden, dim), dtype, -bound2, bound2)
    b2 = jax.random.uniform(k4, (dim,), dtype, -bound2, bound2)
    return w1, b1, w2, b2


def feedforward_ref(x, w1, b1, w2, b2, compute_dtype=jnp.bfloat16):
    """Pure-JAX reference mirroring the kernel's bf16-operand / f32-accumulate numerics."""
    B, S, D = x.shape
    H = w2.shape[0]
    xc = x.reshape(-1, D).astype(compute_dtype)
    val = jnp.dot(xc, w1[:, :H].astype(compute_dtype),
                  preferred_element_type=jnp.float32) + b1[:H].astype(jnp.float32)
    gate = jnp.dot(xc, w1[:, H:].astype(compute_dtype),
                   preferred_element_type=jnp.float32) + b1[H:].astype(jnp.float32)
    y = val * _gelu_exact(gate)
    out = jnp.dot(y.astype(compute_dtype), w2.astype(compute_dtype),
                  preferred_element_type=jnp.float32) + b2.astype(jnp.float32)
    return out.reshape(B, S, D).astype(x.dtype)


def feedforward_ref_f32(x, w1, b1, w2, b2):
    """Full-f32 reference path (kept for numerics sanity; not used for tight asserts)."""
    h = jnp.einsum("bsd,dh->bsh", x, w1) + b1
    H = w2.shape[0]
    val, gates = h[..., :H], h[..., H:]
    y = val * _gelu_exact(gates)
    return jnp.einsum("bsh,hd->bsd", y, w2) + b2


if __name__ == "__main__":
    B, S, dim, mult = 2, 8, 32, 4
    key = jax.random.PRNGKey(0)
    kx, kp = jax.random.split(key)
    x = jax.random.normal(kx, (B, S, dim), jnp.float32)
    w1, b1, w2, b2 = init_params(kp, dim, mult)

    out = feedforward(x, w1, b1, w2, b2)
    out = jax.block_until_ready(out)

    ref = feedforward_ref(x, w1, b1, w2, b2)
    assert out.shape == (B, S, dim)
    assert jnp.allclose(out, ref, atol=2e-3, rtol=2e-3), "mismatch vs reference"
    print("KERNEL_OK")
</pallas_src>

<mosaic_0001>
module attributes {stable_mosaic.version = 11 : i64} {
  func.func @feedforward_kernel(%arg0: i32, %arg1: i32, %arg2: memref<16x32xbf16, #tpu.memory_space<vmem>>, %arg3: memref<32x128xbf16, #tpu.memory_space<vmem>>, %arg4: memref<32x128xbf16, #tpu.memory_space<vmem>>, %arg5: memref<1x128xf32, #tpu.memory_space<vmem>>, %arg6: memref<1x128xf32, #tpu.memory_space<vmem>>, %arg7: memref<128x32xbf16, #tpu.memory_space<vmem>>, %arg8: memref<1x32xf32, #tpu.memory_space<vmem>>, %arg9: memref<16x32xf32, #tpu.memory_space<vmem>>, %arg10: memref<16x32xf32, #tpu.memory_space<vmem>>) attributes {dimension_semantics = [#tpu.dimension_semantics<parallel>, #tpu.dimension_semantics<arbitrary>], iteration_bounds = array<i64: 1, 1>, scalar_prefetch = 0 : i64, scratch_operands = 1 : i64, tpu.core_type = #tpu.core_type<tc>, window_params = [{transform_indices = @transform_0, window_bounds = array<i64: 16, 32>}, {transform_indices = @transform_1, window_bounds = array<i64: 32, 128>}, {transform_indices = @transform_2, window_bounds = array<i64: 32, 128>}, {transform_indices = @transform_3, window_bounds = array<i64: 1, 128>}, {transform_indices = @transform_4, window_bounds = array<i64: 1, 128>}, {transform_indices = @transform_5, window_bounds = array<i64: 128, 32>}, {pipeline_mode = #tpu.pipeline_mode<synchronous>, transform_indices = @transform_6, window_bounds = array<i64: 1, 32>}, {transform_indices = @transform_7, window_bounds = array<i64: 16, 32>}]} {
    %c0_i32 = arith.constant 0 : i32
    %0 = arith.cmpi eq, %arg1, %c0_i32 : i32
    %1 = arith.extui %0 : i1 to i32
    %c0_i32_0 = arith.constant 0 : i32
    %2 = arith.cmpi ne, %1, %c0_i32_0 : i32
    scf.if %2 {
      %cst_23 = arith.constant 0.000000e+00 : f32
      %33 = vector.broadcast %cst_23 : f32 to vector<16x32xf32>
      %c0_24 = arith.constant 0 : index
      %c0_25 = arith.constant 0 : index
      %34 = vector.load %arg10[%c0_24, %c0_25] : memref<16x32xf32, #tpu.memory_space<vmem>>, vector<16x32xf32>
      tpu.vector_store %arg10[%c0_24, %c0_25], %33 {strides = array<i32>} : memref<16x32xf32, #tpu.memory_space<vmem>>, vector<16x32xf32>,
    } else {
    }
    %c0 = arith.constant 0 : index
    %c0_1 = arith.constant 0 : index
    %3 = vector.load %arg2[%c0, %c0_1] : memref<16x32xbf16, #tpu.memory_space<vmem>>, vector<16x32xbf16>
    %c0_2 = arith.constant 0 : index
    %c0_3 = arith.constant 0 : index
    %4 = vector.load %arg3[%c0_2, %c0_3] : memref<32x128xbf16, #tpu.memory_space<vmem>>, vector<32x128xbf16>
    %cst = arith.constant dense<0.000000e+00> : vector<16x128xf32>
    %5 = tpu.matmul %3, %4, %cst {dimension_numbers = #tpu.dot_dimension_numbers<[1], [0], [0], [1], [0, 0, 1, 1], [], []>} : vector<16x32xbf16>, vector<32x128xbf16>, vector<16x128xf32> -> vector<16x128xf32>
    %c0_4 = arith.constant 0 : index
    %c0_5 = arith.constant 0 : index
    %6 = vector.load %arg5[%c0_4, %c0_5] : memref<1x128xf32, #tpu.memory_space<vmem>>, vector<1x128xf32>
    %7 = vector.broadcast %6 : vector<1x128xf32> to vector<16x128xf32>
    %8 = arith.addf %5, %7 : vector<16x128xf32>
    %c0_6 = arith.constant 0 : index
    %c0_7 = arith.constant 0 : index
    %9 = vector.load %arg4[%c0_6, %c0_7] : memref<32x128xbf16, #tpu.memory_space<vmem>>, vector<32x128xbf16>
    %cst_8 = arith.constant dense<0.000000e+00> : vector<16x128xf32>
    %10 = tpu.matmul %3, %9, %cst_8 {dimension_numbers = #tpu.dot_dimension_numbers<[1], [0], [0], [1], [0, 0, 1, 1], [], []>} : vector<16x32xbf16>, vector<32x128xbf16>, vector<16x128xf32> -> vector<16x128xf32>
    %c0_9 = arith.constant 0 : index
    %c0_10 = arith.constant 0 : index
    %11 = vector.load %arg6[%c0_9, %c0_10] : memref<1x128xf32, #tpu.memory_space<vmem>>, vector<1x128xf32>
    %12 = vector.broadcast %11 : vector<1x128xf32> to vector<16x128xf32>
    %13 = arith.addf %10, %12 : vector<16x128xf32>
    %cst_11 = arith.constant 5.000000e-01 : f32
    %14 = vector.broadcast %cst_11 : f32 to vector<16x128xf32>
    %15 = arith.mulf %14, %13 : vector<16x128xf32>
    %cst_12 = arith.constant 2.000000e+00 : f32
    %16 = math.sqrt %cst_12 : f32
    %17 = vector.broadcast %16 : f32 to vector<16x128xf32>
    %18 = arith.divf %13, %17 : vector<16x128xf32>
    %19 = math.erf %18 : vector<16x128xf32>
    %cst_13 = arith.constant 1.000000e+00 : f32
    %20 = vector.broadcast %cst_13 : f32 to vector<16x128xf32>
    %21 = arith.addf %20, %19 : vector<16x128xf32>
    %22 = arith.mulf %15, %21 : vector<16x128xf32>
    %23 = arith.mulf %8, %22 : vector<16x128xf32>
    %c0_14 = arith.constant 0 : index
    %c0_15 = arith.constant 0 : index
    %24 = vector.load %arg10[%c0_14, %c0_15] : memref<16x32xf32, #tpu.memory_space<vmem>>, vector<16x32xf32>
    %25 = arith.truncf %23 : vector<16x128xf32> to vector<16x128xbf16>
    %c0_16 = arith.constant 0 : index
    %c0_17 = arith.constant 0 : index
    %26 = vector.load %arg7[%c0_16, %c0_17] : memref<128x32xbf16, #tpu.memory_space<vmem>>, vector<128x32xbf16>
    %cst_18 = arith.constant dense<0.000000e+00> : vector<16x32xf32>
    %27 = tpu.matmul %25, %26, %cst_18 {dimension_numbers = #tpu.dot_dimension_numbers<[1], [0], [0], [1], [0, 0, 1, 1], [], []>} : vector<16x128xbf16>, vector<128x32xbf16>, vector<16x32xf32> -> vector<16x32xf32>
    %28 = arith.addf %24, %27 : vector<16x32xf32>
    %c0_19 = arith.constant 0 : index
    %c0_20 = arith.constant 0 : index
    %29 = vector.load %arg10[%c0_19, %c0_20] : memref<16x32xf32, #tpu.memory_space<vmem>>, vector<16x32xf32>
    tpu.vector_store %arg10[%c0_19, %c0_20], %28 {strides = array<i32>} : memref<16x32xf32, #tpu.memory_space<vmem>>, vector<16x32xf32>,
    %c0_i32_21 = arith.constant 0 : i32
    %30 = arith.cmpi eq, %arg1, %c0_i32_21 : i32
    %31 = arith.extui %30 : i1 to i32
    %c0_i32_22 = arith.constant 0 : i32
    %32 = arith.cmpi ne, %31, %c0_i32_22 : i32
    scf.if %32 {
      %c0_23 = arith.constant 0 : index
      %c0_24 = arith.constant 0 : index
      %33 = vector.load %arg10[%c0_23, %c0_24] : memref<16x32xf32, #tpu.memory_space<vmem>>, vector<16x32xf32>
      %c0_25 = arith.constant 0 : index
      %c0_26 = arith.constant 0 : index
      %34 = vector.load %arg8[%c0_25, %c0_26] : memref<1x32xf32, #tpu.memory_space<vmem>>, vector<1x32xf32>
      %35 = vector.broadcast %34 : vector<1x32xf32> to vector<16x32xf32>
      %36 = arith.addf %33, %35 : vector<16x32xf32>
      %c0_27 = arith.constant 0 : index
      %c0_28 = arith.constant 0 : index
      %37 = vector.load %arg9[%c0_27, %c0_28] : memref<16x32xf32, #tpu.memory_space<vmem>>, vector<16x32xf32>
      tpu.vector_store %arg9[%c0_27, %c0_28], %36 {strides = array<i32>} : memref<16x32xf32, #tpu.memory_space<vmem>>, vector<16x32xf32>,
    } else {
    }
    return
  }
  func.func @transform_0(%arg0: i32, %arg1: i32) -> (i32, i32) {
    %c0_i32 = arith.constant 0 : i32
    %c0_i32_0 = arith.constant 0 : i32
    return %arg0, %c0_i32 : i32, i32
  }
  func.func @transform_1(%arg0: i32, %arg1: i32) -> (i32, i32) {
    %c0_i32 = arith.constant 0 : i32
    %c0_i32_0 = arith.constant 0 : i32
    return %c0_i32, %arg1 : i32, i32
  }
  func.func @transform_2(%arg0: i32, %arg1: i32) -> (i32, i32) {
    %c0_i32 = arith.constant 0 : i32
    %c0_i32_0 = arith.constant 0 : i32
    return %c0_i32, %arg1 : i32, i32
  }
  func.func @transform_3(%arg0: i32, %arg1: i32) -> (i32, i32) {
    %c0_i32 = arith.constant 0 : i32
    %c0_i32_0 = arith.constant 0 : i32
    return %c0_i32, %arg1 : i32, i32
  }
  func.func @transform_4(%arg0: i32, %arg1: i32) -> (i32, i32) {
    %c0_i32 = arith.constant 0 : i32
    %c0_i32_0 = arith.constant 0 : i32
    return %c0_i32, %arg1 : i32, i32
  }
  func.func @transform_5(%arg0: i32, %arg1: i32) -> (i32, i32) {
    %c0_i32 = arith.constant 0 : i32
    %c0_i32_0 = arith.constant 0 : i32
    return %arg1, %c0_i32 : i32, i32
  }
  func.func @transform_6(%arg0: i32, %arg1: i32) -> (i32, i32) {
    %c0_i32 = arith.constant 0 : i32
    %c0_i32_0 = arith.constant 0 : i32
    %c0_i32_1 = arith.constant 0 : i32
    return %c0_i32, %c0_i32_0 : i32, i32
  }
  func.func @transform_7(%arg0: i32, %arg1: i32) -> (i32, i32) {
    %c0_i32 = arith.constant 0 : i32
    %c0_i32_0 = arith.constant 0 : i32
    return %arg0, %c0_i32 : i32, i32
  }
}

</mosaic_0001>

<bundles_post_ra>
// kernel: tpu_custom_call.1
= control target key start
LH: loop header
LB: loop body
LE: loop exit
PB: predicated region body
PF: predicated region fallthrough
CT: control target
= control target key end

     0   :  { %v446_v1 = vmov 0.0   ;;  %vm447_vm0 = vmmov 0   ;;  %vm32_vm1 = vcmask 261120   ;;  %s559_s0 = inlined_call_operand.vmem [shape: bf16[16,32], index: 0, kind: input, shape index: {}]   ;;  %s560_s1 = inlined_call_operand.vmem [shape: bf16[32,128], index: 1, kind: input, shape index: {}]   ;;  %s561_s2 = inlined_call_operand.vmem [shape: bf16[32,128], index: 2, kind: input, shape index: {}]   ;;  %s562_s3 = inlined_call_operand.vmem [shape: f32[1,128], index: 3, kind: input, shape index: {}]   ;;  %s563_s4 = inlined_call_operand.vmem [shape: f32[1,128], index: 4, kind: input, shape index: {}]   ;;  %s564_s5 = inlined_call_operand.vmem [shape: bf16[128,32], index: 5, kind: input, shape index: {}]   ;;  %s565_s6 = inlined_call_operand.vmem [shape: f32[1,32], index: 6, kind: input, shape index: {}]   ;;  %s566_s7 = inlined_call_operand.hbm [shape: f32[16,32], index: 7, kind: output, shape index: {}]  }
   0x1   :  { %v405_v0 = vld [vmem:[%s560_s1] sm:$0xff]   ;;  %364 = vmatprep.subr.bf16.mxu1 %v446_v1  ;;  %380 = vmatprep.subr.bf16.mxu0 %v446_v1  ;;  %v406_v2 = vld [vmem:[%s560_s1 + $0x8] sm:$0xff]   ;;  %33 = vst.msk [vmem:[#allocation2] sm:$0xff] %vm32_vm1, %v446_v1  ;;  %34 = vst.msk [vmem:[#allocation2 + $0x8] sm:$0xff] %vm32_vm1, %v446_v1 }
   0x2   :  { %365 = vmatpush3.bf16.msra.mxu1 %v405_v0  ;;  %368 = vmatprep.mubr.msk.bf16.mxu1 %vm447_vm0, %v446_v1  ;;  %v407_v3 = vld [vmem:[%s559_s0] sm:$0xff]   ;;  %v409_v5 = vld [vmem:[%s561_s2 + $0x8] sm:$0xff]  }
   0x3   :  { %366 = vmatprep.subr.bf16.mxu1 %v446_v1  ;;  %396 = vmatprep.mubr.msk.bf16.mxu0 %vm447_vm0, %v446_v1  ;;  %v408_v4 = vld [vmem:[%s561_s2] sm:$0xff]  }
   0x6   :  { %367 = vmatpush3.bf16.msra.mxu1 %v406_v2 }
   0x7   :  { %372 = vmatprep.subr.bf16.mxu1 %v446_v1 }
   0x9   :  { %369 = vmatmul.mubr.msk.bf16.vlgmr.msra.gmra.mrb[0].mxu1 %vm32_vm1, %v407_v3 }
   0xa   :  { %373 = vmatpush3.bf16.msra.mxu1 %v408_v4  ;;  %376 = vmatprep.mubr.msk.bf16.mxu1 %vm447_vm0, %v446_v1 }
   0xb   :  { %12 = vsyncpa [#allocation4], 0  ;;  %374 = vmatprep.subr.bf16.mxu1 %v446_v1  ;;  %v410_v6 = vld [vmem:[%s564_s5] sm:$0xff]   ;;  %v411_v7 = vld [vmem:[%s564_s5 + $0x8] sm:$0xff]   ;;  %s448_s27 = smov [#allocation3]  }
   0xc   :  { %381 = vmatpush3.bf16.msra.mxu0 %v410_v6  ;;  %v412_v8 = vld [vmem:[%s564_s5 + $0x10] sm:$0xff]   ;;  %v413_v9 = vld [vmem:[%s564_s5 + $0x18] sm:$0xff]   ;;  %v414_v10 = vld [vmem:[%s564_s5 + $0x20] sm:$0xff]   ;;  %s320_s28 = sshll.u32 %s448_s27, 4  ;;  %s321_s28 = int_to_ptr.vmem [resolvable:$true] %s320_s28 }
   0xd   :  { %382 = vmatprep.subr.bf16.mxu0 %v446_v1  ;;  %v415_v11 = vld [vmem:[%s564_s5 + $0x28] sm:$0xff]   ;;  %v416_v12 = vld [vmem:[%s564_s5 + $0x30] sm:$0xff]   ;;  %v417_v13 = vld [vmem:[%s564_s5 + $0x38] sm:$0xff]   ;;  %s422_s29 = scalar_lea.vmem %s321_s28, 256  ;;  %p427_p1 = scmp.lt.s32.totalorder %s321_s28, %s321_s28 }
   0xe   :  { %375 = vmatpush3.bf16.msra.mxu1 %v409_v5  ;;  %v336_v18 = vld [vmem:[%s563_s4] ss:$0 sm:$0xff]  ;;  %v188_v43 = vld [vmem:[#allocation2 + $0x8] sm:$0xff]  ;;  %p423_p0 = scmp.ne.s32.totalorder %s321_s28, %s422_s29  ;;  %p428_p2 = scmp.lt.s32.totalorder %s422_s29, %s422_s29 }
   0xf   :  { %v331_v28 = vld [vmem:[%s562_s3] ss:$0 sm:$0xff] }
  0x10   :  { %383 = vmatpush3.bf16.msra.mxu0 %v411_v7  ;;  %v187_v41 = vld [vmem:[#allocation2] sm:$0xff]  ;;  %p429_p3 = por %p428_p2, %p427_p1 }
  0x11   :  { %377 = vmatmul.mubr.msk.bf16.vlgmr.msra.gmra.mrb[4].mxu1 %vm32_vm1, %v407_v3  ;;  %384 = vmatprep.subr.bf16.mxu0 %v446_v1  ;;  %v348_v49 = vld [vmem:[%s565_s6] ss:$0 sm:$0xff] }
  0x12   :  { %p430_p4 = pnand %p429_p3, %p423_p0 }
  0x14   :  { %385 = vmatpush3.bf16.msra.mxu0 %v412_v8 }
  0x15   :  { %386 = vmatprep.subr.bf16.mxu0 %v446_v1 }
  0x18   :  { %387 = vmatpush3.bf16.msra.mxu0 %v413_v9 }
  0x19   :  { %388 = vmatprep.subr.bf16.mxu0 %v446_v1 }
  0x1c   :  { %389 = vmatpush3.bf16.msra.mxu0 %v414_v10 }
  0x1d   :  { %390 = vmatprep.subr.bf16.mxu0 %v446_v1 }
  0x20   :  { %391 = vmatpush3.bf16.msra.mxu0 %v415_v11 }
  0x21   :  { %392 = vmatprep.subr.bf16.mxu0 %v446_v1 }
  0x24   :  { %393 = vmatpush3.bf16.msra.mxu0 %v416_v12 }
  0x25   :  { %394 = vmatprep.subr.bf16.mxu0 %v446_v1 }
  0x28   :  { %395 = vmatpush3.bf16.msra.mxu0 %v417_v13 }
  0xdc   :  { %v103_v14 = vpop.f32.mrb[0].mxu1 }
  0xdd   :  { %v370_v15 = vpop.f32.mrb[1].mxu1  ;;  %v104_v32 = vadd.f32 %v331_v28, %v103_v14 }
  0xde   :  { %v106_v16 = vpop.f32.mrb[2].mxu1 }
  0xdf   :  { %v371_v17 = vpop.f32.mrb[3].mxu1  ;;  %v107_v36 = vadd.f32 %v331_v28, %v106_v16 }
  0xe4   :  { %v167_v19 = vpop.f32.mrb[4].mxu1 }
  0xe5   :  { %v168_v20 = vadd.f32 %v336_v18, %v167_v19  ;;  %v378_v21 = vpop.f32.mrb[5].mxu1 }
  0xe6   :  { %v170_v22 = vpop.f32.mrb[6].mxu1 }
  0xe7   :  { %v177_v23 = vmul.f32 0.70710677, %v168_v20  ;;  %v171_v24 = vadd.f32 %v336_v18, %v170_v22  ;;  %v379_v25 = vpop.f32.mrb[7].mxu1  ;;  %v174_v29 = vmul.f32 0.5, %v168_v20 }
  0xe9   :  { %418 = verf.f32 %v177_v23  ;;  %v178_v26 = vmul.f32 0.70710677, %v171_v24  ;;  %v175_v34 = vmul.f32 0.5, %v171_v24 }
  0xeb   :  { %420 = verf.f32 %v178_v26 }
  0xf3   :  { %v419_v27 = vpop.eup %418 }
  0xf4   :  { %v181_v30 = vadd.f32 1.0, %v419_v27 }
  0xf5   :  { %v421_v31 = vpop.eup %420 }
  0xf6   :  { %v183_v33 = vmul.f32 %v181_v30, %v174_v29  ;;  %v182_v35 = vadd.f32 1.0, %v421_v31 }
  0xf8   :  { %v184_v37 = vmul.f32 %v182_v35, %v175_v34  ;;  %v185_v38 = vmul.f32 %v183_v33, %v104_v32 }
  0xfa   :  { %v186_v39 = vmul.f32 %v184_v37, %v107_v36 }
  0xfc   :  { %v189_v40 = vpack.c.bf16 %v186_v39, %v185_v38 }
  0xfe   :  { %397 = vmatmul.mubr.bf16.vlgmr.msra.gmra.mrb[0].mxu0 %v189_v40 }
 0x1d1   :  { %v288_v42 = vpop.f32.mrb[0].mxu0 }
 0x1d2   :  { %v295_v44 = vadd.f32 %v288_v42, %v187_v41  ;;  %v398_v45 = vpop.f32.mrb[1].mxu0 }
 0x1d3   :  { %v291_v46 = vpop.f32.mrb[2].mxu0 }
 0x1d4   :  { %297 = vst.msk [vmem:[#allocation2] sm:$0xff] %vm32_vm1, %v295_v44  ;;  %v296_v47 = vadd.f32 %v291_v46, %v188_v43  ;;  %v399_v48 = vpop.f32.mrb[3].mxu0 }
 0x1d6   :  { %298 = vst.msk [vmem:[#allocation2 + $0x8] sm:$0xff] %vm32_vm1, %v296_v47 }
 0x1db   :  { %v302_v50 = vld [vmem:[#allocation2] sm:$0xff] }
 0x1dc   :  { %v311_v51 = vadd.f32 %v348_v49, %v302_v50 }
 0x1dd   :  { %v303_v52 = vld [vmem:[#allocation2 + $0x8] sm:$0xff] }
 0x1de   :  { %v312_v53 = vadd.f32 %v348_v49, %v303_v52  ;;  %313 = vst.msk [vmem:[#allocation3] sm:$0xff] %vm32_vm1, %v311_v51 }
 0x1e0   :  { %314 = vst.msk [vmem:[#allocation3 + $0x8] sm:$0xff] %vm32_vm1, %v312_v53 }
 0x1e1   :  { %433 = shalt.err (!%p430_p4)
}
 0x1e2   :  { %s434_s8 = scalar_lea.hbm %s566_s7, 256 }
 0x1e3   :  { %p435_p5 = scmp.ne.s32.totalorder %s566_s7, %s434_s8  ;;  %p438_p6 = scmp.lt.u32.totalorder %s434_s8, %s566_s7 }
 0x1e5   :  { %p440_p7 = pnand %p438_p6, %p435_p5 }
 0x1e7   :  { %443 = shalt.err (!%p440_p7)
}
 0x1e8   :  { %s449_s11 = smov 128   ;;  %s450_s12 = smov 8  }
 0x1e9   :  { %326 = dma.vmem_to_hbm [thread:$0]  %s321_s28, 256, %s566_s7, [#allocation4], %s449_s11, %s449_s11, %s450_s12  }
 0x1ea   :  { %444 = dma.done.wait [#allocation4], 256  }
 0x1eb   :  { %445 = vsyncadd [#allocation4], 4294967040 }
 0x1ec   :  { %330 = vsyncpa [#allocation4], 1 }

</bundles_post_ra>
